<compile_context>
chip_gen: v6e
topology: v6e:2x2x1
jax: 0.10.0
libtpu: 0.0.40
codegen_flags: <defaults>
</compile_context>

<pallas_src>
import jax
import jax.numpy as jnp
from jax.experimental import pallas as pl
from jax.experimental.pallas import tpu as pltpu


def _round_up(x, m):
    return ((x + m - 1) // m) * m


def _make_gru_chunk_kernel(t_total, chunk, hidden_size):
    """Builds the per-chunk kernel (t_total / chunk / H are static)."""
    H = hidden_size

    def kernel(x_ref, h0_ref, wx_ref, whzr_ref, whc_ref, b_ref,
               wout_ref, bout_ref, out_ref, hcarry_ref, gx_ref, hs_ref):
        c = pl.program_id(0)

        @pl.when(c == 0)
        def _():
            hcarry_ref[...] = h0_ref[...]

        # Hoisted x-side projection for the whole chunk: one (Tc,I)@(I,3H)
        # matmul + fused bias. Columns are [z | r | candidate].
        gx_ref[...] = (
            jnp.dot(x_ref[...], wx_ref[...], preferred_element_type=jnp.float32)
            + b_ref[...])

        base = c * chunk

        def step(i, h):
            gx = gx_ref[pl.ds(i, 1), :]                      # (1, 3H)

            # z, r gates share one (1,H)@(H,2H) matmul on the hidden side.
            zr = jax.nn.sigmoid(
                gx[:, : 2 * H]
                + jnp.dot(h, whzr_ref[...],
                          preferred_element_type=jnp.float32))
            z = zr[:, :H]
            r = zr[:, H:]

            # Candidate: reset applied to h BEFORE its matmul.
            h_cand = jnp.tanh(
                gx[:, 2 * H:]
                + jnp.dot(r * h, whc_ref[...],
                          preferred_element_type=jnp.float32))

            h_new = (1.0 - z) * h + z * h_cand

            # Mask padded timesteps so the hidden carry stays exact for any T.
            keep = ((base + i) < t_total).astype(jnp.float32)
            h_new = keep * h_new + (1.0 - keep) * h

            hs_ref[pl.ds(i, 1), :] = h_new                   # row i of h history
            return h_new                                     # register carry

        h_final = jax.lax.fori_loop(0, chunk, step, hcarry_ref[...])
        hcarry_ref[...] = h_final                            # carry across chunks

        # Deferred, batched readout + numerically-stable log-softmax for the
        # whole chunk (one MXU op, one block store).
        logits = (jnp.dot(hs_ref[...], wout_ref[...],
                          preferred_element_type=jnp.float32) + bout_ref[...])
        m = jnp.max(logits, axis=1, keepdims=True)
        shifted = logits - m
        lse = jnp.log(jnp.sum(jnp.exp(shifted), axis=1, keepdims=True))
        out_ref[...] = shifted - lse

    return kernel


def prepare_weights(params, input_size):
    """One-time fusion/transposition of PyTorch-layout params (call at init)."""
    I = input_size
    wz, wr, wh = params["W_z"], params["W_r"], params["W_h"]
    return {
        # x-side weights of z / r / candidate fused to (I, 3H)
        "wx": jnp.concatenate([wz[:, :I].T, wr[:, :I].T, wh[:, :I].T], axis=1),
        # h-side weights of z / r fused to (H, 2H)
        "wh_zr": jnp.concatenate([wz[:, I:].T, wr[:, I:].T], axis=1),
        # h-side weight of the candidate stays separate (reset applied first)
        "wh_c": wh[:, I:].T,                                  # (H, H)
        # fused biases (1, 3H)
        "b": jnp.concatenate(
            [params["b_z"].T, params["b_r"].T, params["b_h"].T], axis=1),
        "w_out": params["W_out"].T,                           # (H, O)
        "b_out": params["b_out"].T,                           # (1, O)
    }


def manual_gru_sequence(xs, hidden, fused, *, max_chunk=128):
    """Run T GRU steps + log-softmax readout in one pallas_call.

    xs: (T, I) inputs, hidden: (1, H) initial state.
    Returns (log_softmax outputs (T, O), final hidden (1, H)).
    """
    T, I = xs.shape
    H = hidden.shape[1]
    O = fused["w_out"].shape[1]

    # Chunk size: multiple of 8 sublanes, capped at max_chunk; pad T up to a
    # multiple of the chunk (padded steps are masked inside the kernel).
    chunk = min(max_chunk, _round_up(T, 8))
    t_pad = _round_up(T, chunk)
    if t_pad != T:
        xs = jnp.pad(xs, ((0, t_pad - T), (0, 0)))
    n_chunks = t_pad // chunk

    kernel = _make_gru_chunk_kernel(T, chunk, H)

    out, h_final = pl.pallas_call(
        kernel,
        out_shape=(jax.ShapeDtypeStruct((t_pad, O), jnp.float32),
                   jax.ShapeDtypeStruct((1, H), jnp.float32)),
        grid=(n_chunks,),
        in_specs=[
            pl.BlockSpec((chunk, I), lambda c: (c, 0)),        # x chunk streamed
            pl.BlockSpec((1, H), lambda c: (0, 0)),            # h0 (resident)
            pl.BlockSpec((I, 3 * H), lambda c: (0, 0)),        # fused x weights
            pl.BlockSpec((H, 2 * H), lambda c: (0, 0)),        # fused z/r h weights
            pl.BlockSpec((H, H), lambda c: (0, 0)),            # candidate h weights
            pl.BlockSpec((1, 3 * H), lambda c: (0, 0)),        # fused biases
            pl.BlockSpec((H, O), lambda c: (0, 0)),            # readout weights
            pl.BlockSpec((1, O), lambda c: (0, 0)),            # readout bias
        ],
        out_specs=(pl.BlockSpec((chunk, O), lambda c: (c, 0)),  # per-chunk outputs
                   pl.BlockSpec((1, H), lambda c: (0, 0))),     # hidden-state carry
        scratch_shapes=[
            pltpu.VMEM((chunk, 3 * H), jnp.float32),            # hoisted x projection
            pltpu.VMEM((chunk, H), jnp.float32),                # per-step h rows
        ],
        compiler_params=pltpu.CompilerParams(
            dimension_semantics=("arbitrary",),                 # recurrent -> sequential
            vmem_limit_bytes=32 * 1024 * 1024),
    )(xs, hidden, fused["wx"], fused["wh_zr"], fused["wh_c"],
      fused["b"], fused["w_out"], fused["b_out"])

    return out[:T], h_final


def manual_gru_forward(x, hidden, fused):
    """Single-step forward, identical semantics to ManualGRU.forward."""
    out, h_new = manual_gru_sequence(x, hidden, fused)   # T = 1
    return out, h_new


# ----------------------------- init + reference -----------------------------

def _xavier_uniform(key, shape):
    fan_out, fan_in = shape
    bound = jnp.sqrt(6.0 / (fan_in + fan_out))
    return jax.random.uniform(key, shape, jnp.float32, -bound, bound)


def init_params(key, input_size, hidden_size, output_size):
    # All params are 2-D, so (as in the PyTorch module) every one of them —
    # including the (H,1)-shaped biases — is xavier-initialized.
    ks = jax.random.split(key, 8)
    return {
        "W_z": _xavier_uniform(ks[0], (hidden_size, input_size + hidden_size)),
        "b_z": _xavier_uniform(ks[1], (hidden_size, 1)),
        "W_r": _xavier_uniform(ks[2], (hidden_size, input_size + hidden_size)),
        "b_r": _xavier_uniform(ks[3], (hidden_size, 1)),
        "W_h": _xavier_uniform(ks[4], (hidden_size, input_size + hidden_size)),
        "b_h": _xavier_uniform(ks[5], (hidden_size, 1)),
        "W_out": _xavier_uniform(ks[6], (output_size, hidden_size)),
        "b_out": _xavier_uniform(ks[7], (output_size, 1)),
    }


def reference_step(x, hidden, params):
    """Pure-JAX transcription of the PyTorch forward, for verification."""
    combined = jnp.concatenate([x, hidden], axis=1).T             # (I+H, 1)
    z = jax.nn.sigmoid(params["W_z"] @ combined + params["b_z"])  # (H, 1)
    r = jax.nn.sigmoid(params["W_r"] @ combined + params["b_r"])
    reset_hidden = r * hidden.T
    combined_reset = jnp.concatenate([x.T, reset_hidden], axis=0)
    h_cand = jnp.tanh(params["W_h"] @ combined_reset + params["b_h"])
    h_new = (1 - z) * hidden.T + z * h_cand
    out = params["W_out"] @ h_new + params["b_out"]
    out = jax.nn.log_softmax(out.T, axis=1)
    return out, h_new.T


def _reference_sequence(xs, hidden0, params, ref_step):
    h = hidden0
    outs = []
    for t in range(xs.shape[0]):
        o, h = ref_step(xs[t:t + 1], h, params)
        outs.append(o)
    return jnp.concatenate(outs, axis=0), h


if __name__ == "__main__":
    input_size, hidden_size, output_size = 16, 32, 8
    seq_len = 8

    key = jax.random.PRNGKey(0)
    k_p, k_x, k_x2 = jax.random.split(key, 3)
    params = init_params(k_p, input_size, hidden_size, output_size)
    fused = prepare_weights(params, input_size)      # one-time weight prep

    xs = jax.random.normal(k_x, (seq_len, input_size), jnp.float32)
    hidden0 = jnp.zeros((1, hidden_size), jnp.float32)   # initHidden()

    ref_step = jax.jit(reference_step)

    # --- single-step forward (exact ManualGRU.forward semantics) ---
    x0 = xs[0:1]
    out1, h1 = manual_gru_forward(x0, hidden0, fused)
    jax.block_until_ready((out1, h1))
    out1_ref, h1_ref = ref_step(x0, hidden0, params)
    assert out1.shape == (1, output_size) and h1.shape == (1, hidden_size)
    assert jnp.allclose(out1, out1_ref, atol=1e-4), "single-step output mismatch"
    assert jnp.allclose(h1, h1_ref, atol=1e-4), "single-step hidden mismatch"

    # --- full-sequence forward (time loop fused into one pallas_call) ---
    out_seq, h_final = manual_gru_sequence(xs, hidden0, fused)
    jax.block_until_ready((out_seq, h_final))
    outs_ref, h_ref = _reference_sequence(xs, hidden0, params, ref_step)
    assert out_seq.shape == (seq_len, output_size)
    assert h_final.shape == (1, hidden_size)
    assert jnp.allclose(out_seq, outs_ref, atol=1e-4), "sequence output mismatch"
    assert jnp.allclose(h_final, h_ref, atol=1e-4), "final hidden mismatch"

    # --- multi-chunk + ragged-tail path (T not a multiple of the chunk) ---
    seq_len2 = 37
    xs2 = jax.random.normal(k_x2, (seq_len2, input_size), jnp.float32)
    out_seq2, h_final2 = manual_gru_sequence(xs2, hidden0, fused, max_chunk=16)
    jax.block_until_ready((out_seq2, h_final2))
    outs_ref2, h_ref2 = _reference_sequence(xs2, hidden0, params, ref_step)
    assert out_seq2.shape == (seq_len2, output_size)
    assert jnp.allclose(out_seq2, outs_ref2, atol=2e-4), "chunked output mismatch"
    assert jnp.allclose(h_final2, h_ref2, atol=2e-4), "chunked hidden mismatch"

    print("KERNEL_OK")
</pallas_src>

<mosaic_0001>
module attributes {stable_mosaic.version = 11 : i64} {
  func.func @kernel(%arg0: i32, %arg1: memref<8x16xf32, #tpu.memory_space<vmem>>, %arg2: memref<1x32xf32, #tpu.memory_space<vmem>>, %arg3: memref<16x96xf32, #tpu.memory_space<vmem>>, %arg4: memref<32x64xf32, #tpu.memory_space<vmem>>, %arg5: memref<32x32xf32, #tpu.memory_space<vmem>>, %arg6: memref<1x96xf32, #tpu.memory_space<vmem>>, %arg7: memref<32x8xf32, #tpu.memory_space<vmem>>, %arg8: memref<1x8xf32, #tpu.memory_space<vmem>>, %arg9: memref<8x8xf32, #tpu.memory_space<vmem>>, %arg10: memref<1x32xf32, #tpu.memory_space<vmem>>, %arg11: memref<8x96xf32, #tpu.memory_space<vmem>>, %arg12: memref<8x32xf32, #tpu.memory_space<vmem>>) attributes {dimension_semantics = [#tpu.dimension_semantics<arbitrary>], iteration_bounds = array<i64: 1>, scalar_prefetch = 0 : i64, scratch_operands = 2 : i64, tpu.core_type = #tpu.core_type<tc>, window_params = [{transform_indices = @transform_0, window_bounds = array<i64: 8, 16>}, {pipeline_mode = #tpu.pipeline_mode<synchronous>, transform_indices = @transform_1, window_bounds = array<i64: 1, 32>}, {pipeline_mode = #tpu.pipeline_mode<synchronous>, transform_indices = @transform_2, window_bounds = array<i64: 16, 96>}, {pipeline_mode = #tpu.pipeline_mode<synchronous>, transform_indices = @transform_3, window_bounds = array<i64: 32, 64>}, {pipeline_mode = #tpu.pipeline_mode<synchronous>, transform_indices = @transform_4, window_bounds = array<i64: 32, 32>}, {pipeline_mode = #tpu.pipeline_mode<synchronous>, transform_indices = @transform_5, window_bounds = array<i64: 1, 96>}, {pipeline_mode = #tpu.pipeline_mode<synchronous>, transform_indices = @transform_6, window_bounds = array<i64: 32, 8>}, {pipeline_mode = #tpu.pipeline_mode<synchronous>, transform_indices = @transform_7, window_bounds = array<i64: 1, 8>}, {transform_indices = @transform_8, window_bounds = array<i64: 8, 8>}, {pipeline_mode = #tpu.pipeline_mode<synchronous>, transform_indices = @transform_9, window_bounds = array<i64: 1, 32>}]} {
    %c0_i32 = arith.constant 0 : i32
    %0 = arith.cmpi eq, %arg0, %c0_i32 : i32
    %1 = arith.extui %0 : i1 to i32
    %c0_i32_0 = arith.constant 0 : i32
    %2 = arith.cmpi ne, %1, %c0_i32_0 : i32
    scf.if %2 {
      %c0_26 = arith.constant 0 : index
      %c0_27 = arith.constant 0 : index
      %32 = vector.load %arg2[%c0_26, %c0_27] : memref<1x32xf32, #tpu.memory_space<vmem>>, vector<1x32xf32>
      %c0_28 = arith.constant 0 : index
      %c0_29 = arith.constant 0 : index
      %33 = vector.load %arg10[%c0_28, %c0_29] : memref<1x32xf32, #tpu.memory_space<vmem>>, vector<1x32xf32>
      tpu.vector_store %arg10[%c0_28, %c0_29], %32 {strides = array<i32>} : memref<1x32xf32, #tpu.memory_space<vmem>>, vector<1x32xf32>,
    } else {
    }
    %c0 = arith.constant 0 : index
    %c0_1 = arith.constant 0 : index
    %3 = vector.load %arg1[%c0, %c0_1] : memref<8x16xf32, #tpu.memory_space<vmem>>, vector<8x16xf32>
    %c0_2 = arith.constant 0 : index
    %c0_3 = arith.constant 0 : index
    %4 = vector.load %arg3[%c0_2, %c0_3] : memref<16x96xf32, #tpu.memory_space<vmem>>, vector<16x96xf32>
    %cst = arith.constant dense<0.000000e+00> : vector<8x96xf32>
    %5 = tpu.matmul %3, %4, %cst {dimension_numbers = #tpu.dot_dimension_numbers<[1], [0], [0], [1], [0, 0, 1, 1], [], []>} : vector<8x16xf32>, vector<16x96xf32>, vector<8x96xf32> -> vector<8x96xf32>
    %c0_4 = arith.constant 0 : index
    %c0_5 = arith.constant 0 : index
    %6 = vector.load %arg6[%c0_4, %c0_5] : memref<1x96xf32, #tpu.memory_space<vmem>>, vector<1x96xf32>
    %7 = vector.broadcast %6 : vector<1x96xf32> to vector<8x96xf32>
    %8 = arith.addf %5, %7 : vector<8x96xf32>
    %c0_6 = arith.constant 0 : index
    %c0_7 = arith.constant 0 : index
    %9 = vector.load %arg11[%c0_6, %c0_7] : memref<8x96xf32, #tpu.memory_space<vmem>>, vector<8x96xf32>
    tpu.vector_store %arg11[%c0_6, %c0_7], %8 {strides = array<i32>} : memref<8x96xf32, #tpu.memory_space<vmem>>, vector<8x96xf32>,
    %c8_i32 = arith.constant 8 : i32
    %10 = arith.muli %arg0, %c8_i32 : i32
    %c0_8 = arith.constant 0 : index
    %c0_9 = arith.constant 0 : index
    %11 = vector.load %arg10[%c0_8, %c0_9] : memref<1x32xf32, #tpu.memory_space<vmem>>, vector<1x32xf32>
    %c0_i32_10 = arith.constant 0 : i32
    %c8_i32_11 = arith.constant 8 : i32
    %12 = arith.addi %c0_i32_10, %c8_i32_11 : i32
    %c1_i32 = arith.constant 1 : i32
    %13 = scf.for %arg13 = %c0_i32_10 to %12 step %c1_i32 iter_args(%arg14 = %11) -> (vector<1x32xf32>)  : i32 {
      %32 = arith.index_cast %arg13 : i32 to index
      %c0_26 = arith.constant 0 : index
      %33 = vector.load %arg11[%32, %c0_26] : memref<8x96xf32, #tpu.memory_space<vmem>>, vector<1x96xf32>
      %34 = vector.extract_strided_slice %33 {offsets = [0, 0], sizes = [1, 64], strides = [1, 1]} : vector<1x96xf32> to vector<1x64xf32>
      %c0_27 = arith.constant 0 : index
      %c0_28 = arith.constant 0 : index
      %35 = vector.load %arg4[%c0_27, %c0_28] : memref<32x64xf32, #tpu.memory_space<vmem>>, vector<32x64xf32>
      %cst_29 = arith.constant dense<0.000000e+00> : vector<1x64xf32>
      %36 = tpu.matmul %arg14, %35, %cst_29 {dimension_numbers = #tpu.dot_dimension_numbers<[1], [0], [0], [1], [0, 0, 1, 1], [], []>} : vector<1x32xf32>, vector<32x64xf32>, vector<1x64xf32> -> vector<1x64xf32>
      %37 = arith.addf %34, %36 : vector<1x64xf32>
      %38 = arith.negf %37 : vector<1x64xf32>
      %39 = math.exp %38 : vector<1x64xf32>
      %cst_30 = arith.constant 1.000000e+00 : f32
      %40 = vector.broadcast %cst_30 : f32 to vector<1x64xf32>
      %41 = arith.addf %40, %39 : vector<1x64xf32>
      %42 = arith.divf %40, %41 : vector<1x64xf32>
      %43 = vector.extract_strided_slice %42 {offsets = [0, 0], sizes = [1, 32], strides = [1, 1]} : vector<1x64xf32> to vector<1x32xf32>
      %44 = vector.extract_strided_slice %42 {offsets = [0, 32], sizes = [1, 32], strides = [1, 1]} : vector<1x64xf32> to vector<1x32xf32>
      %45 = vector.extract_strided_slice %33 {offsets = [0, 64], sizes = [1, 32], strides = [1, 1]} : vector<1x96xf32> to vector<1x32xf32>
      %46 = arith.mulf %44, %arg14 : vector<1x32xf32>
      %c0_31 = arith.constant 0 : index
      %c0_32 = arith.constant 0 : index
      %47 = vector.load %arg5[%c0_31, %c0_32] : memref<32x32xf32, #tpu.memory_space<vmem>>, vector<32x32xf32>
      %cst_33 = arith.constant dense<0.000000e+00> : vector<1x32xf32>
      %48 = tpu.matmul %46, %47, %cst_33 {dimension_numbers = #tpu.dot_dimension_numbers<[1], [0], [0], [1], [0, 0, 1, 1], [], []>} : vector<1x32xf32>, vector<32x32xf32>, vector<1x32xf32> -> vector<1x32xf32>
      %49 = arith.addf %45, %48 : vector<1x32xf32>
      %50 = math.tanh %49 : vector<1x32xf32>
      %cst_34 = arith.constant 1.000000e+00 : f32
      %51 = vector.broadcast %cst_34 : f32 to vector<1x32xf32>
      %52 = arith.subf %51, %43 : vector<1x32xf32>
      %53 = arith.mulf %52, %arg14 : vector<1x32xf32>
      %54 = arith.mulf %43, %50 : vector<1x32xf32>
      %55 = arith.addf %53, %54 : vector<1x32xf32>
      %56 = arith.addi %10, %arg13 : i32
      %c1_i32_35 = arith.constant 1 : i32
      %57 = arith.cmpi slt, %56, %c1_i32_35 : i32
      %58 = arith.extui %57 : i1 to i32
      %59 = arith.sitofp %58 : i32 to f32
      %60 = vector.broadcast %59 : f32 to vector<1x32xf32>
      %61 = arith.mulf %60, %55 : vector<1x32xf32>
      %cst_36 = arith.constant 1.000000e+00 : f32
      %62 = arith.subf %cst_36, %59 : f32
      %63 = vector.broadcast %62 : f32 to vector<1x32xf32>
      %64 = arith.mulf %63, %arg14 : vector<1x32xf32>
      %65 = arith.addf %61, %64 : vector<1x32xf32>
      %66 = arith.index_cast %arg13 : i32 to index
      %c0_37 = arith.constant 0 : index
      %67 = vector.load %arg12[%66, %c0_37] : memref<8x32xf32, #tpu.memory_space<vmem>>, vector<1x32xf32>
      tpu.vector_store %arg12[%66, %c0_37], %65 {strides = array<i32>} : memref<8x32xf32, #tpu.memory_space<vmem>>, vector<1x32xf32>,
      scf.yield %65 : vector<1x32xf32>
    }
    %c8_i32_12 = arith.constant 8 : i32
    %c0_13 = arith.constant 0 : index
    %c0_14 = arith.constant 0 : index
    %14 = vector.load %arg10[%c0_13, %c0_14] : memref<1x32xf32, #tpu.memory_space<vmem>>, vector<1x32xf32>
    tpu.vector_store %arg10[%c0_13, %c0_14], %13 {strides = array<i32>} : memref<1x32xf32, #tpu.memory_space<vmem>>, vector<1x32xf32>,
    %c0_15 = arith.constant 0 : index
    %c0_16 = arith.constant 0 : index
    %15 = vector.load %arg12[%c0_15, %c0_16] : memref<8x32xf32, #tpu.memory_space<vmem>>, vector<8x32xf32>
    %c0_17 = arith.constant 0 : index
    %c0_18 = arith.constant 0 : index
    %16 = vector.load %arg7[%c0_17, %c0_18] : memref<32x8xf32, #tpu.memory_space<vmem>>, vector<32x8xf32>
    %cst_19 = arith.constant dense<0.000000e+00> : vector<8x8xf32>
    %17 = tpu.matmul %15, %16, %cst_19 {dimension_numbers = #tpu.dot_dimension_numbers<[1], [0], [0], [1], [0, 0, 1, 1], [], []>} : vector<8x32xf32>, vector<32x8xf32>, vector<8x8xf32> -> vector<8x8xf32>
    %c0_20 = arith.constant 0 : index
    %c0_21 = arith.constant 0 : index
    %18 = vector.load %arg8[%c0_20, %c0_21] : memref<1x8xf32, #tpu.memory_space<vmem>>, vector<1x8xf32>
    %19 = vector.broadcast %18 : vector<1x8xf32> to vector<8x8xf32>
    %20 = arith.addf %17, %19 : vector<8x8xf32>
    %cst_22 = arith.constant dense<0xFF800000> : vector<8xf32>
    %21 = vector.multi_reduction <maximumf>, %20, %cst_22 [1] : vector<8x8xf32> to vector<8xf32>
    %22 = vector.shape_cast %21 : vector<8xf32> to vector<8x1xf32>
    %23 = vector.broadcast %22 : vector<8x1xf32> to vector<8x8xf32>
    %24 = arith.subf %20, %23 : vector<8x8xf32>
    %25 = math.exp %24 : vector<8x8xf32>
    %cst_23 = arith.constant dense<0.000000e+00> : vector<8xf32>
    %26 = vector.multi_reduction <add>, %25, %cst_23 [1] : vector<8x8xf32> to vector<8xf32>
    %27 = vector.shape_cast %26 : vector<8xf32> to vector<8x1xf32>
    %28 = math.log %27 : vector<8x1xf32>
    %29 = vector.broadcast %28 : vector<8x1xf32> to vector<8x8xf32>
    %30 = arith.subf %24, %29 : vector<8x8xf32>
    %c0_24 = arith.constant 0 : index
    %c0_25 = arith.constant 0 : index
    %31 = vector.load %arg9[%c0_24, %c0_25] : memref<8x8xf32, #tpu.memory_space<vmem>>, vector<8x8xf32>
    tpu.vector_store %arg9[%c0_24, %c0_25], %30 {strides = array<i32>} : memref<8x8xf32, #tpu.memory_space<vmem>>, vector<8x8xf32>,
    return
  }
  func.func @transform_0(%arg0: i32) -> (i32, i32) {
    %c0_i32 = arith.constant 0 : i32
    %c0_i32_0 = arith.constant 0 : i32
    return %arg0, %c0_i32 : i32, i32
  }
  func.func @transform_1(%arg0: i32) -> (i32, i32) {
    %c0_i32 = arith.constant 0 : i32
    %c0_i32_0 = arith.constant 0 : i32
    %c0_i32_1 = arith.constant 0 : i32
    return %c0_i32, %c0_i32_0 : i32, i32
  }
  func.func @transform_2(%arg0: i32) -> (i32, i32) {
    %c0_i32 = arith.constant 0 : i32
    %c0_i32_0 = arith.constant 0 : i32
    %c0_i32_1 = arith.constant 0 : i32
    return %c0_i32, %c0_i32_0 : i32, i32
  }
  func.func @transform_3(%arg0: i32) -> (i32, i32) {
    %c0_i32 = arith.constant 0 : i32
    %c0_i32_0 = arith.constant 0 : i32
    %c0_i32_1 = arith.constant 0 : i32
    return %c0_i32, %c0_i32_0 : i32, i32
  }
  func.func @transform_4(%arg0: i32) -> (i32, i32) {
    %c0_i32 = arith.constant 0 : i32
    %c0_i32_0 = arith.constant 0 : i32
    %c0_i32_1 = arith.constant 0 : i32
    return %c0_i32, %c0_i32_0 : i32, i32
  }
  func.func @transform_5(%arg0: i32) -> (i32, i32) {
    %c0_i32 = arith.constant 0 : i32
    %c0_i32_0 = arith.constant 0 : i32
    %c0_i32_1 = arith.constant 0 : i32
    return %c0_i32, %c0_i32_0 : i32, i32
  }
  func.func @transform_6(%arg0: i32) -> (i32, i32) {
    %c0_i32 = arith.constant 0 : i32
    %c0_i32_0 = arith.constant 0 : i32
    %c0_i32_1 = arith.constant 0 : i32
    return %c0_i32, %c0_i32_0 : i32, i32
  }
  func.func @transform_7(%arg0: i32) -> (i32, i32) {
    %c0_i32 = arith.constant 0 : i32
    %c0_i32_0 = arith.constant 0 : i32
    %c0_i32_1 = arith.constant 0 : i32
    return %c0_i32, %c0_i32_0 : i32, i32
  }
  func.func @transform_8(%arg0: i32) -> (i32, i32) {
    %c0_i32 = arith.constant 0 : i32
    %c0_i32_0 = arith.constant 0 : i32
    return %arg0, %c0_i32 : i32, i32
  }
  func.func @transform_9(%arg0: i32) -> (i32, i32) {
    %c0_i32 = arith.constant 0 : i32
    %c0_i32_0 = arith.constant 0 : i32
    %c0_i32_1 = arith.constant 0 : i32
    return %c0_i32, %c0_i32_0 : i32, i32
  }
}

</mosaic_0001>

<bundles_post_ra>
// kernel: tpu_custom_call.1
= control target key start
LH: loop header
LB: loop body
LE: loop exit
PB: predicated region body
PF: predicated region fallthrough
CT: control target
= control target key end

     0   :  { %15 = vsyncpa [#allocation5], 0  ;;  %s862_s0 = inlined_call_operand.vmem [shape: f32[8,16], index: 0, kind: input, shape index: {}]   ;;  %s863_s1 = inlined_call_operand.vmem [shape: f32[1,32], index: 1, kind: input, shape index: {}]   ;;  %s864_s2 = inlined_call_operand.hbm [shape: f32[16,96], index: 2, kind: input, shape index: {}]   ;;  %s865_s3 = inlined_call_operand.vmem [shape: f32[32,64], index: 3, kind: input, shape index: {}]   ;;  %s866_s4 = inlined_call_operand.hbm [shape: f32[32,32], index: 4, kind: input, shape index: {}]   ;;  %s867_s5 = inlined_call_operand.vmem [shape: f32[1,96], index: 5, kind: input, shape index: {}]   ;;  %s868_s6 = inlined_call_operand.vmem [shape: f32[32,8], index: 6, kind: input, shape index: {}]   ;;  %s869_s7 = inlined_call_operand.vmem [shape: f32[1,8], index: 7, kind: input, shape index: {}]   ;;  %s870_s8 = inlined_call_operand.hbm [shape: f32[8,8], index: 8, kind: output, shape index: {0}]   ;;  %s871_s9 = inlined_call_operand.hbm [shape: f32[1,32], index: 9, kind: output, shape index: {1}]  }
   0x1   :  { %16 = vsyncpa [#allocation8], 0 }
   0x2   :  { %17 = vsyncpa [#allocation6], 0 }
   0x3   :  { %18 = vsyncpa [#allocation11], 0  ;;  %s710_s30 = smov [#allocation4]  }
   0x4   :  { %s28_s10 = sshll.u32 %s710_s30, 4  ;;  %s29_s10 = int_to_ptr.vmem [resolvable:$true] %s28_s10 }
   0x5   :  { %s614_s11 = scalar_lea.vmem %s29_s10, 256  ;;  %p619_p1 = scmp.lt.s32.totalorder %s29_s10, %s29_s10 }
   0x6   :  { %p615_p0 = scmp.ne.s32.totalorder %s29_s10, %s614_s11  ;;  %p620_p2 = scmp.lt.s32.totalorder %s614_s11, %s614_s11 }
   0x8   :  { %p621_p3 = por %p620_p2, %p619_p1 }
   0xa   :  { %p622_p4 = pnand %p621_p3, %p615_p0 }
   0xc   :  { %625 = shalt.err (!%p622_p4)
}
   0xd   :  { %s711_s12 = smov 128   ;;  %s712_s13 = smov 8  }
   0xe   :  { %34 = dma.hbm_to_vmem [thread:$0]  %s864_s2, 256, %s29_s10, [#allocation5], %s711_s12, %s711_s12, %s712_s13  }
   0xf   :  { %s713_s16 = smov [#allocation7]  }
  0x10   :  { %s42_s17 = sshll.u32 %s713_s16, 4  ;;  %s43_s17 = int_to_ptr.vmem [resolvable:$true] %s42_s17 }
  0x11   :  { %s634_s18 = scalar_lea.vmem %s43_s17, 512  ;;  %p639_p6 = scmp.lt.s32.totalorder %s43_s17, %s43_s17 }
  0x12   :  { %p635_p5 = scmp.ne.s32.totalorder %s43_s17, %s634_s18  ;;  %p640_p7 = scmp.lt.s32.totalorder %s634_s18, %s634_s18 }
  0x14   :  { %p641_p8 = por %p640_p7, %p639_p6 }
  0x16   :  { %p642_p9 = pnand %p641_p8, %p635_p5 }
  0x18   :  { %645 = shalt.err (!%p642_p9)
}
  0x19   :  { %48 = dma.hbm_to_vmem [thread:$0]  %s866_s4, 512, %s43_s17, [#allocation8], %s711_s12, %s711_s12, %s712_s13  }
  0x1a   :  { %694 = dma.done.wait [#allocation5], 256  }
  0x1b   :  { %695 = vsyncadd [#allocation5], 4294967040 }
  0x1c   :  { %696 = dma.done.wait [#allocation8], 512  }
  0x1d   :  { %697 = vsyncadd [#allocation8], 4294966784  ;;  %v714_v0 = vmov 0.0   ;;  %vm715_vm0 = vmmov 0   ;;  %vm66_vm1 = vcmask 253952   ;;  %v70_v2 = vld [vmem:[#allocation4 + $0x8] sm:$0xff] }
  0x1e   :  { %527 = vmatprep.subr.mxu0 %v714_v0  ;;  %531 = vmatprep.mubr.msk.f32.mxu0 %vm715_vm0, %v714_v0  ;;  %v65_v1 = vld [vmem:[%s863_s1] sm:$0x1]  ;;  %v69_v3 = vld [vmem:[#allocation4] sm:$0xff]  ;;  %vm78_vm2 = vcmask 130048   ;;  %vm152_vm3 = vcmask 785408   ;;  %s795_s1 = smov 0  }
  0x1f   :  { %67 = vst.msk [vmem:[#allocation10] sm:$0x1] %vm66_vm1, %v65_v1  ;;  %528 = vmatpush3.msra.mxu0 %v70_v2  ;;  %v68_v4 = vld [vmem:[%s862_s0] sm:$0xff] }
  0x20   :  { %529 = vmatprep.subr.mxu0 %v714_v0  ;;  %v502_v6 = vld [vmem:[%s867_s5] ss:$0 sm:$0xff] }
  0x21   :  { %530 = vmatpush3.msra.mxu0 %v69_v3 }
  0x22   :  { %532 = vmatmul.mubr.msk.f32.vlgmr.msra.gmra.mxu0 %vm78_vm2, %v68_v4 }
  0x26   :  { %v155_v5 = vld [vmem:[#allocation10] sm:$0x1]  }
  0xe2   :  { %v148_v7 = vpop.f32.mrf.mxu0 }
  0xe3   :  { %v149_v8 = vadd.f32 %v502_v6, %v148_v7 }
  0xe4   :  { %v533_v9 = vpop.f32.mrf.mxu0 }
  0xe5   :  { %153 = vst.msk [vmem:[#allocation2] sm:$0xff] %vm152_vm3, %v149_v8 }
  0xe6 LB: > { %v168_v10 = vld [vmem:[%s865_s3 + $0x18] sm:$0xff]  ;;  %v716_v11 = vmov 0.0   ;;  %v167_v12 = vld [vmem:[%s865_s3 + $0x10] sm:$0xff]  ;;  %vm717_vm4 = vmmov 0   ;;  %s718_s27 = smov 32   ;;  %v166_v13 = vld [vmem:[%s865_s3 + $0x8] sm:$0xff]  ;;  %s708_s1 = sphi %s795_s1, %s161_s1   ;;  %v704_v5 = vphi %v155_v5, %v872_v5  }
  0xe7   : > { %534 = vmatprep.subr.mxu0 %v716_v11  ;;  %542 = vmatprep.mubr.msk.f32.mxu0 %vm717_vm4, %v716_v11  ;;  %v165_v14 = vld [vmem:[%s865_s3] sm:$0xff]  ;;  %vm169_vm5 = vcmask 261120   ;;  %v257_v15 = vld [vmem:[#allocation7 + $0x18] sm:$0xff]  ;;  %v256_v16 = vld [vmem:[#allocation7 + $0x10] sm:$0xff]  ;;  %s163_s11 = scalar_lea.vmem [#allocation2], %s708_s1  ;;  %s719_s12 = smov 96  }
  0xe8   : > { %535 = vmatpush3.msra.mxu0 %v168_v10  ;;  %250 = vrot.lane.b32.xlu0 %v704_v5, %s718_s27  ;;  %v255_v17 = vld [vmem:[#allocation7 + $0x8] sm:$0xff]  ;;  %v254_v18 = vld [vmem:[#allocation7] sm:$0xff]  ;;  %s720_s13 = smov 64   ;;  %p348_p10 = scmp.lt.s32.totalorder %s708_s1, 1 }
  0xe9   : > { %536 = vmatprep.subr.mxu0 %v716_v11  ;;  %545 = vmatprep.subr.mxu1 %v716_v11  ;;  %s357_s17 = scalar_lea.vmem [#allocation3], %s708_s1  ;;  %s161_s1 = sadd.s32 1, %s708_s1  }
  0xea   : > { %537 = vmatpush3.msra.mxu0 %v167_v12  ;;  %553 = vmatprep.mubr.msk.f32.mxu1 %vm717_vm4, %v716_v11  ;;  %s349_s14 = scalar_select %p348_p10, 1, 0 }
  0xeb   : > { %538 = vmatprep.subr.mxu0 %v716_v11  ;;  %546 = vmatpush3.msra.mxu1 %v257_v15  ;;  %p158_p11 = scmp.ge.s32.totalorder %s161_s1, 8  }
  0xec   : > { %539 = vmatpush3.msra.mxu0 %v166_v13  ;;  %547 = vmatprep.subr.mxu1 %v716_v11  ;;  %v164_v19 = vld [vmem:[%s163_s11] sm:$0x1]  ;;  %s350_s15 = scvt.s32.f32 %s349_s14  ;;  %v366_v45 = vld [vmem:[%s868_s6 + $0x18] sm:$0xff] (%p158_p11)  ;;  %v365_v46 = vld [vmem:[%s868_s6 + $0x10] sm:$0xff] (%p158_p11)  ;;  %vm448_vm6 = vcmask (%p158_p11), 64512  }
  0xed   : > { %540 = vmatprep.subr.mxu0 %v716_v11  ;;  %548 = vmatpush3.msra.mxu1 %v256_v16  ;;  %v364_v47 = vld [vmem:[%s868_s6 + $0x8] sm:$0xff] (%p158_p11)  ;;  %v363_v48 = vld [vmem:[%s868_s6] sm:$0xff] (%p158_p11)  ;;  %s721_s6 = smov (%p158_p11), [#allocation10]  }
  0xee   : > { %541 = vmatpush3.msra.mxu0 %v165_v14  ;;  %549 = vmatprep.subr.mxu1 %v716_v11  ;;  %s353_s16 = ssub.f32 1.0, %s350_s15  ;;  %v351_v40 = vstv %s350_s15  ;;  %v507_v50 = vld [vmem:[%s869_s7] ss:$0 sm:$0xff] (%p158_p11)  ;;  %s478_s1 = sshll.u32 (%p158_p11), %s721_s6, 4  ;;  %s479_s1 = int_to_ptr.vmem [resolvable:$true] %s478_s1 }
  0xef   : > { %543 = vmatmul.mubr.msk.f32.vlgmr.msra.gmra.mxu0 %vm169_vm5, %v704_v5  ;;  %550 = vmatpush3.msra.mxu1 %v255_v17  ;;  %s646_s0 = scalar_lea.vmem (%p158_p11), %s479_s1, 16  ;;  %s650_s7 = scalar_lea.vmem (%p158_p11), %s479_s1, 32 }
  0xf0   : > { %551 = vmatprep.subr.mxu1 %v716_v11  ;;  %v354_v36 = vstv %s353_s16  ;;  %556 = vmatprep.subr.mxu0 (%p158_p11), %v714_v0  ;;  %p647_p12 = scmp.ne.s32.totalorder (%p158_p11), %s479_s1, %s646_s0  ;;  %p651_p13 = scmp.lt.s32.totalorder (%p158_p11), %s479_s1, %s479_s1 }
  0xf1   : > { %552 = vmatpush3.msra.mxu1 %v254_v18  ;;  %v355_v41 = vmul.f32 %v704_v5, %v354_v36  ;;  %564 = vmatprep.mubr.msk.f32.mxu0 (%p158_p11), %vm715_vm0, %v714_v0  ;;  %p652_p0 = scmp.lt.s32.totalorder (%p158_p11), %s650_s7, %s646_s0 }
  0xf2   :  { %557 = vmatpush3.msra.mxu0 (%p158_p11), %v366_v45 }
  0xf3   :  { %558 = vmatprep.subr.mxu0 (%p158_p11), %v714_v0  ;;  %p653_p1 = por (%p158_p11), %p652_p0, %p651_p13 }
  0xf4   :  { %559 = vmatpush3.msra.mxu0 (%p158_p11), %v365_v46 }
  0xf5   :  { %560 = vmatprep.subr.mxu0 (%p158_p11), %v714_v0  ;;  %p654_p2 = pnand (%p158_p11), %p653_p1, %p647_p12 }
  0xf6   :  { %561 = vmatpush3.msra.mxu0 (%p158_p11), %v364_v47 }
  0xf7   :  { %562 = vmatprep.subr.mxu0 (%p158_p11), %v714_v0 }
  0xf8   :  { %563 = vmatpush3.msra.mxu0 (%p158_p11), %v363_v48 }
 0x15a   : > { %v251_v26 = vpop.permute.xlu0 %250 }
 0x1af   : > { %v239_v20 = vpop.f32.mrf.mxu0 }
 0x1b0   : > { %v243_v21 = vadd.f32 %v239_v20, %v164_v19 }
 0x1b1   : > { %v544_v22 = vpop.f32.mrf.mxu0 }
 0x1b2   : > { %v505_v23 = vmul.f32 -1.442695, %v243_v21 }
 0x1b4   : > { %596 = vpow2.f32 %v505_v23 }
 0x1c1   : > { %v597_v24 = vpop.eup %596 }
 0x1c2   : > { %v247_v25 = vadd.f32 1.0, %v597_v24 }
 0x1c4   : > { %598 = vrcp.f32 %v247_v25 }
 0x1d1   : > { %v599_v27 = vpop.eup %598 }
 0x1d2   : > { %v253_v28 = vmul.f32 %v599_v27, %v251_v26  ;;  %v339_v35 = vsub.f32 1.0, %v599_v27 }
 0x1d4   : > { %259 = vrot.lane.b32.xlu0 %v253_v28, %s719_s12  ;;  %v340_v38 = vmul.f32 %v704_v5, %v339_v35 }
 0x246   : > { %v260_v29 = vpop.permute.xlu0 %259 }
 0x247   : > { %554 = vmatmul.mubr.msk.f32.vlgmr.msra.gmra.mxu1 %vm169_vm5, %v260_v29 }
 0x307   : > { %v329_v30 = vpop.f32.mrf.mxu1 }
 0x308   : > { %334 = vrot.lane.b32.xlu1 %v329_v30, %s720_s13 }
 0x309   : > { %v555_v31 = vpop.f32.mrf.mxu1 }
 0x37a   : > { %v335_v32 = vpop.permute.xlu1 %334 }
 0x37b   : > { %v337_v33 = vadd.f32 %v335_v32, %v164_v19 }
 0x37d   : > { %600 = vtanh.f32 %v337_v33 }
 0x38a   : > { %v601_v34 = vpop.eup %600 }
 0x38b   : > { %342 = vrot.lane.b32.xlu1 %v601_v34, %s720_s13 }
 0x3fd   : > { %v343_v37 = vpop.permute.xlu1 %342 }
 0x3fe   : > { %v345_v39 = vmul.f32 %v599_v27, %v343_v37 }
 0x400   : > { %v346_v42 = vadd.f32 %v345_v39, %v340_v38 }
 0x402   : > { %v352_v43 = vmul.f32 %v351_v40, %v346_v42  ;;  %160 = sbr.rel (!%p158_p11) target bundleno = 230 (0xe6), region = 81 }
 0x404   : > { %v356_v44 = vadd.f32 %v355_v41, %v352_v43  }
 0x406   : > { %359 = vst.msk [vmem:[%s357_s17] sm:$0x1] %vm66_vm1, %v356_v44  ;;  %v872_v5 = vmov %v356_v44  ;;  %361 = vst.msk [vmem:[#allocation10] sm:$0x1] (%p158_p11), %vm66_vm1, %v356_v44 }
 0x40d   :  { %v362_v49 = vld [vmem:[#allocation3] sm:$0xff] }
 0x40e   :  { %565 = vmatmul.mubr.msk.f32.vlgmr.msra.gmra.mxu0 %vm169_vm5, %v362_v49 }
 0x4ce   :  { %v444_v51 = vpop.f32.mrf.mxu0 }
 0x4cf   :  { %v445_v52 = vadd.f32 %v507_v50, %v444_v51 }
 0x4d0   :  { %v566_v53 = vpop.f32.mrf.mxu0 }
 0x4d1   :  { %v449_v54 = vsel %vm448_vm6, %v445_v52, -inf }
 0x4d2   :  { %450 = vmax.xlane.f32.xlu0 %v449_v54 }
 0x55b   :  { %v451_v55 = vpop.xlane.xlu0 %450 }
 0x55c   :  { %v452_v56 = vsub.f32 %v445_v52, %v451_v55 }
 0x55e   :  { %v453_v57 = vmul.f32 1.442695, %v452_v56 }
 0x560   :  { %602 = vpow2.f32 %v453_v57 }
 0x56d   :  { %v603_v58 = vpop.eup %602 }
 0x56e   :  { %v455_v59 = vsel %vm448_vm6, %v603_v58, 0.0 }
 0x56f   :  { %456 = vadd.xlane.f32.xlu0 %v455_v59 }
 0x570   :  { %657 = shalt.err (!%p654_p2)
}
 0x571   :  { %481 = dma.vmem_to_hbm [thread:$0]  %s479_s1, 16, %s871_s9, [#allocation11]  }
 0x572   :  { %s722_s26 = smov [#allocation9]  }
 0x573   :  { %s468_s27 = sshll.u32 %s722_s26, 4  ;;  %s469_s27 = int_to_ptr.vmem [resolvable:$true] %s468_s27 }
 0x574   :  { %s666_s28 = scalar_lea.vmem %s469_s27, 128  ;;  %p671_p4 = scmp.lt.s32.totalorder %s469_s27, %s469_s27 }
 0x575   :  { %p667_p3 = scmp.ne.s32.totalorder %s469_s27, %s666_s28  ;;  %p672_p5 = scmp.lt.s32.totalorder %s666_s28, %s666_s28 }
 0x577   :  { %p673_p6 = por %p672_p5, %p671_p4 }
 0x579   :  { %p674_p7 = pnand %p673_p6, %p667_p3 }
 0x5f8   :  { %v457_v60 = vpop.xlane.xlu0 %456 }
 0x5f9   :  { %604 = vlog2.f32 %v457_v60 }
 0x606   :  { %v605_v61 = vpop.eup %604 }
 0x607   :  { %v459_v62 = vmul.f32 0.6931472, %v605_v61 }
 0x609   :  { %v460_v63 = vsub.f32 %v452_v56, %v459_v62 }
 0x60b   :  { %461 = vst.msk [vmem:[#allocation9] sm:$0xff] %vm448_vm6, %v460_v63 }
 0x60c   :  { %677 = shalt.err (!%p674_p7)
}
 0x60d   :  { %471 = dma.vmem_to_hbm [thread:$0]  %s469_s27, 128, %s870_s8, [#allocation6]  }
 0x60e   :  { %698 = dma.done.wait [#allocation6], 128  }
 0x60f   :  { %699 = vsyncadd [#allocation6], 4294967168 }
 0x610   :  { %700 = dma.done.wait [#allocation11], 16  }
 0x611   :  { %701 = vsyncadd [#allocation11], 4294967280 }
 0x612   :  { %488 = vsyncpa [#allocation5], 1 }
 0x613   :  { %489 = vsyncpa [#allocation8], 1 }
 0x614   :  { %490 = vsyncpa [#allocation6], 1 }
 0x615   :  { %491 = vsyncpa [#allocation11], 1 }

</bundles_post_ra>
